<compile_context>
chip_gen: v6e
topology: v6e:2x2x1
jax: 0.10.0
libtpu: 0.0.40
codegen_flags: <defaults>
</compile_context>

<pallas_src>
import math

import jax
import jax.numpy as jnp
from jax.experimental import pallas as pl
from jax.experimental.pallas import tpu as pltpu

IN_FEATURES = 20


def _round_up(n, m):
    return ((n + m - 1) // m) * m


def _critic_z_kernel(x_ref, w_ref, b_ref, o_ref):
    # x_ref: (20, TB) VMEM   -- batch tile on the lane axis
    # w_ref: (20, 1)  VMEM   -- weight column (W^T of PyTorch's (1, 20))
    # b_ref: (1, 1)   SMEM   -- scalar bias
    # o_ref: (1, TB)  VMEM   -- lane-dense output slab
    prod = x_ref[...] * w_ref[...]                     # VPU broadcast multiply
    acc = jnp.sum(prod, axis=0, keepdims=True)         # XLU sublane reduce -> (1, TB)
    o_ref[...] = (acc + b_ref[0, 0]).astype(o_ref.dtype)


def critic_z_forward(x, w_t, b, *, lane_tile=512):
    """Forward pass of CriticZ: y = x @ W^T + b.

    Args:
      x:   (B, 20) float32
      w_t: (20, 1) float32  (transpose of PyTorch's (1, 20) weight)
      b:   (1,)    float32
    Returns:
      (B, 1) float32
    """
    B, F = x.shape
    assert F == IN_FEATURES, "CriticZ expects 20 input features"

    # Lane-dense layout: batch on the last (128-lane) axis.
    xT = x.T  # (20, B)

    # Tile the batch axis; tiles are multiples of 128 lanes, capped at
    # `lane_tile` so the double-buffered footprint stays tiny even on v7x's
    # 64 MiB VMEM. 20 sublanes * 512 lanes * 4 B ~= 40 KiB per buffer.
    tb = min(lane_tile, _round_up(B, 128))
    b_pad = _round_up(B, tb)
    if b_pad != B:
        xT = jnp.pad(xT, ((0, 0), (0, b_pad - B)))

    b_smem = b.reshape(1, 1).astype(jnp.float32)

    yT = pl.pallas_call(
        _critic_z_kernel,
        out_shape=jax.ShapeDtypeStruct((1, b_pad), jnp.float32),
        grid=(b_pad // tb,),
        in_specs=[
            pl.BlockSpec((F, tb), lambda i: (0, i)),        # x tile (lane-dense)
            pl.BlockSpec((F, 1), lambda i: (0, 0)),         # weight column (full array)
            pl.BlockSpec(memory_space=pltpu.MemorySpace.SMEM),  # scalar bias
        ],
        out_specs=pl.BlockSpec((1, tb), lambda i: (0, i)),
        compiler_params=pltpu.CompilerParams(
            dimension_semantics=("parallel",),
        ),
    )(xT, w_t, b_smem)

    # Back to the PyTorch-facing (B, 1) layout; drop lane padding.
    return yT[:, :B].T


def init_critic_z_params(key, in_features=IN_FEATURES, out_features=1):
    """Deterministic init matching PyTorch nn.Linear's default
    (uniform in [-1/sqrt(fan_in), 1/sqrt(fan_in)])."""
    k_w, k_b = jax.random.split(key)
    bound = 1.0 / math.sqrt(in_features)
    # PyTorch stores weight as (out, in); we keep its transpose (in, out).
    w_t = jax.random.uniform(
        k_w, (in_features, out_features), jnp.float32, -bound, bound
    )
    b = jax.random.uniform(k_b, (out_features,), jnp.float32, -bound, bound)
    return w_t, b


if __name__ == "__main__":
    key = jax.random.PRNGKey(0)
    k_params, k_x = jax.random.split(key)

    # Small batch of 20-dim latent vectors, as the module implies.
    B = 8
    x = jax.random.normal(k_x, (B, IN_FEATURES), dtype=jnp.float32)

    w_t, b = init_critic_z_params(k_params)

    y = critic_z_forward(x, w_t, b)
    jax.block_until_ready(y)

    # Sanity check against plain JAX reference.
    y_ref = x @ w_t + b.reshape(1, 1)
    assert y.shape == (B, 1)
    assert jnp.allclose(y, y_ref, atol=1e-5, rtol=1e-5)

    # NOTE: at tiny B this op is launch-overhead dominated; in production
    # either batch many calls or let XLA fuse it. For large B the kernel
    # streams lane-dense (20, TB) tiles at near HBM roofline.
    print("KERNEL_OK")
</pallas_src>

<mosaic_0001>
module attributes {stable_mosaic.version = 11 : i64} {
  func.func @_critic_z_kernel(%arg0: i32, %arg1: memref<20x128xf32, #tpu.memory_space<vmem>>, %arg2: memref<20x1xf32, #tpu.memory_space<vmem>>, %arg3: memref<1x1xf32, #tpu.memory_space<smem>>, %arg4: memref<1x128xf32, #tpu.memory_space<vmem>>) attributes {dimension_semantics = [#tpu.dimension_semantics<parallel>], iteration_bounds = array<i64: 1>, scalar_prefetch = 0 : i64, scratch_operands = 0 : i64, tpu.core_type = #tpu.core_type<tc>, window_params = [{transform_indices = @transform_0, window_bounds = array<i64: 20, 128>}, {pipeline_mode = #tpu.pipeline_mode<synchronous>, transform_indices = @transform_1, window_bounds = array<i64: 20, 1>}, {transform_indices = @transform_2, window_bounds = array<i64: 1, 1>}, {transform_indices = @transform_3, window_bounds = array<i64: 1, 128>}]} {
    %c0 = arith.constant 0 : index
    %c0_0 = arith.constant 0 : index
    %0 = vector.load %arg1[%c0, %c0_0] : memref<20x128xf32, #tpu.memory_space<vmem>>, vector<20x128xf32>
    %c0_1 = arith.constant 0 : index
    %c0_2 = arith.constant 0 : index
    %1 = vector.load %arg2[%c0_1, %c0_2] : memref<20x1xf32, #tpu.memory_space<vmem>>, vector<20x1xf32>
    %2 = vector.broadcast %1 : vector<20x1xf32> to vector<20x128xf32>
    %3 = arith.mulf %0, %2 : vector<20x128xf32>
    %cst = arith.constant dense<0.000000e+00> : vector<128xf32>
    %4 = vector.multi_reduction <add>, %3, %cst [0] : vector<20x128xf32> to vector<128xf32>
    %5 = vector.shape_cast %4 : vector<128xf32> to vector<1x128xf32>
    %c0_3 = arith.constant 0 : index
    %c0_4 = arith.constant 0 : index
    %6 = memref.load %arg3[%c0_3, %c0_4] : memref<1x1xf32, #tpu.memory_space<smem>>
    %7 = vector.broadcast %6 : f32 to vector<1x128xf32>
    %8 = arith.addf %5, %7 : vector<1x128xf32>
    %c0_5 = arith.constant 0 : index
    %c0_6 = arith.constant 0 : index
    %9 = vector.load %arg4[%c0_5, %c0_6] : memref<1x128xf32, #tpu.memory_space<vmem>>, vector<1x128xf32>
    tpu.vector_store %arg4[%c0_5, %c0_6], %8 {strides = array<i32>} : memref<1x128xf32, #tpu.memory_space<vmem>>, vector<1x128xf32>,
    return
  }
  func.func @transform_0(%arg0: i32) -> (i32, i32) {
    %c0_i32 = arith.constant 0 : i32
    %c0_i32_0 = arith.constant 0 : i32
    return %c0_i32, %arg0 : i32, i32
  }
  func.func @transform_1(%arg0: i32) -> (i32, i32) {
    %c0_i32 = arith.constant 0 : i32
    %c0_i32_0 = arith.constant 0 : i32
    %c0_i32_1 = arith.constant 0 : i32
    return %c0_i32, %c0_i32_0 : i32, i32
  }
  func.func @transform_2(%arg0: i32) -> (i32, i32) {
    %c0_i32 = arith.constant 0 : i32
    %c0_i32_0 = arith.constant 0 : i32
    %c0_i32_1 = arith.constant 0 : i32
    return %c0_i32, %c0_i32_0 : i32, i32
  }
  func.func @transform_3(%arg0: i32) -> (i32, i32) {
    %c0_i32 = arith.constant 0 : i32
    %c0_i32_0 = arith.constant 0 : i32
    return %c0_i32, %arg0 : i32, i32
  }
}

</mosaic_0001>

<bundles_post_ra>
// kernel: tpu_custom_call.1
= control target key start
LH: loop header
LB: loop body
LE: loop exit
PB: predicated region body
PF: predicated region fallthrough
CT: control target
= control target key end

     0   :  { %v94_v2 = vmov 0   ;;  %s140_s0 = inlined_call_operand.vmem [shape: f32[20,128], index: 0, kind: input, shape index: {}]   ;;  %s141_s1 = inlined_call_operand.vmem [shape: f32[20,1], index: 1, kind: input, shape index: {}]   ;;  %s142_s2 = inlined_call_operand.<no memory space> [shape: f32[1,1], index: 2, kind: input, shape index: {}]   ;;  %s143_s3 = inlined_call_operand.hbm [shape: f32[1,128], index: 3, kind: output, shape index: {}]  }
   0x1   :  { %v19_v0 = vld [vmem:[%s141_s1] sm:$0xff]  ;;  %v21_v1 = vld [vmem:[%s141_s1 + $0x10] sm:$0xf]  ;;  %70 = vset.pattern.permute.xlu0 %v94_v2  ;;  %71 = vset.pattern.permute.xlu1 %v94_v2 }
   0x2   :  { %9 = vsyncpa [#allocation4], 0  ;;  %24 = vperm.xlu0 %70, %v19_v0   ;;  %34 = vperm.xlu1 %71, %v21_v1   ;;  %v20_v3 = vld [vmem:[%s141_s1 + $0x8] sm:$0xff]  ;;  %v18_v4 = vld [vmem:[%s140_s0 + $0x10] sm:$0xf]  ;;  %vm41_vm0 = vcmask 1043456   ;;  %v51_v21 = vstv %s142_s2 }
   0x3   :  { %v16_v7 = vld [vmem:[%s140_s0] sm:$0xff]  ;;  %v17_v8 = vld [vmem:[%s140_s0 + $0x8] sm:$0xff]  ;;  %s95_s25 = smov [#allocation3]  }
   0x4   :  { %s60_s26 = sshll.u32 %s95_s25, 4  ;;  %s61_s26 = int_to_ptr.vmem [resolvable:$true] %s60_s26 }
   0x5   :  { %s72_s0 = scalar_lea.vmem %s61_s26, 16  ;;  %s76_s27 = scalar_lea.vmem %s61_s26, 32 }
   0x6   :  { %29 = vperm.xlu0 %70, %v20_v3   ;;  %p73_p0 = scmp.ne.s32.totalorder %s61_s26, %s72_s0  ;;  %p77_p1 = scmp.lt.s32.totalorder %s61_s26, %s61_s26 }
   0x7   :  { %p78_p2 = scmp.lt.s32.totalorder %s76_s27, %s72_s0 }
   0x9   :  { %p79_p3 = por %p78_p2, %p77_p1 }
   0xb   :  { %p80_p4 = pnand %p79_p3, %p73_p0 }
  0x7d   :  { %v25_v5 = vpop.permute.xlu0 %24  ;;  %v35_v6 = vpop.permute.xlu1 %34 }
  0x7e   :  { %v39_v9 = vmul.f32 %v35_v6, %v18_v4  ;;  %v37_v11 = vmul.f32 %v25_v5, %v16_v7 }
  0x80   :  { %v42_v13 = vsel %vm41_vm0, %v39_v9, 0.0 }
  0x81   :  { %v30_v10 = vpop.permute.xlu0 %29 }
  0x82   :  { %v38_v12 = vmul.f32 %v30_v10, %v17_v8 }
  0x84   :  { %v40_v14 = vadd.f32 %v38_v12, %v37_v11 }
  0x86   :  { %v43_v15 = vadd.f32 %v42_v13, %v40_v14 }
  0x88   :  { %v44_v16 = vrot.slane %v43_v15, 4 }
  0x8a   :  { %v45_v17 = vadd.f32 %v44_v16, %v43_v15 }
  0x8c   :  { %v46_v18 = vrot.slane %v45_v17, 2 }
  0x8e   :  { %v47_v19 = vadd.f32 %v46_v18, %v45_v17 }
  0x90   :  { %v48_v20 = vrot.slane %v47_v19, 1 }
  0x92   :  { %v49_v22 = vadd.f32 %v48_v20, %v47_v19 }
  0x94   :  { %v52_v23 = vadd.f32 %v51_v21, %v49_v22 }
  0x96   :  { %53 = vst [vmem:[#allocation3] sm:$0x1] %v52_v23 }
  0x97   :  { %83 = shalt.err (!%p80_p4)
}
  0x98   :  { %63 = dma.vmem_to_hbm [thread:$0]  %s61_s26, 16, %s143_s3, [#allocation4]  }
  0x99   :  { %92 = dma.done.wait [#allocation4], 16  }
  0x9a   :  { %93 = vsyncadd [#allocation4], 4294967280 }
  0x9b   :  { %67 = vsyncpa [#allocation4], 1 }

</bundles_post_ra>
